<compile_context>
chip_gen: v7x
topology: tpu7x:2x2x1
jax: 0.10.0
libtpu: 0.0.40
codegen_flags: <defaults>
</compile_context>

<pallas_src>
import functools
import math

import jax
import jax.numpy as jnp
from jax.experimental import pallas as pl
from jax.experimental.pallas import tpu as pltpu


POSE_DIM = 7            # quaternion (4) + translation (3)
FEAT_DIM = 7            # [x3d | x2d | w2d] channels fed to the pose head
CH = 8                  # slab channels: [x3d(3) | x2d(2) | w2d(2) | ones(1)]
OUT_PAD = 128           # lane-dense padded output width (pose lives in lanes 0..6)
_LANES = 128


def _round_up(x, m):
    return ((x + m - 1) // m) * m


def _cdiv(a, b):
    return -(-a // b)


def _recip(x, eps):
    """1 / (x + eps) via EUP approx reciprocal + one Newton step (no vdiv, ~f32 accurate)."""
    d = x + eps
    r = pl.reciprocal(d, approx=True)
    return r * (2.0 - d * r)


def _solver_kernel(feat_ref, w_head_ref, b_head_ref, out_ref, acc_ref, *,
                   eps, normalize, n_points):
    """One (batch-block, point-tile) grid step of the weighted-pooling + pose-head solver.

    feat_ref  : (Bblk, 8, tn)   fused lane-dense slab [x3d|x2d|w2d|ones]; zero-padded points
    w_head_ref: (8, 128)        pose-head weight; rows 0..6 / cols 0..6 valid, rest zero
    b_head_ref: (1, 128)        pose-head bias; cols 0..6 valid, rest zero
    out_ref   : (Bblk, 128)     lane-dense pose output (resident across the point axis)
    acc_ref   : (Bblk, 8, tn)   f32 full-width partial-sum accumulator (whole-vreg adds only)
    """
    n_idx = pl.program_id(1)

    @pl.when(n_idx == 0)
    def _init():
        acc_ref[...] = jnp.zeros_like(acc_ref)

    # --- hot loop: one load, one sublane-broadcast mul, one whole-vreg add -----------
    f = feat_ref[...].astype(jnp.float32)                 # (Bblk, 8, tn)
    # per-point scalar weight = mean of the two w2d channels (zero on padded points)
    w = 0.5 * (f[:, 5:6, :] + f[:, 6:7, :])               # (Bblk, 1, tn)
    # channels 0..6 accumulate feat*w ; channel 7 (ones) accumulates w  (the denominator)
    acc_ref[...] += f * w

    @pl.when(n_idx == pl.num_programs(1) - 1)
    def _finalize():
        s = jnp.sum(acc_ref[...], axis=-1, keepdims=True)     # (Bblk, 8, 1)
        sum_w = s[:, 7:8, :]                                   # (Bblk, 1, 1)  Σw

        if normalize:
            # Per-batch mean-normalization of w is a uniform scale, so it commutes with
            # the sums (exactly equivalent to normalizing each w before pooling).
            inv_mean = _recip(sum_w * (1.0 / n_points), eps)   # 1 / (mean(w) + eps)
            s = s * inv_mean
            sum_w = sum_w * inv_mean

        pooled = s * _recip(sum_w, eps)                        # (Bblk, 8, 1)

        # 7x7 pose head as lane-broadcast MACs + a sublane reduce; head params are
        # zero-padded to 128 lanes so the output is a full-width unmasked store.
        w_head = w_head_ref[...]                               # (8, 128)
        pose = jnp.sum(pooled * w_head[None, :, :], axis=1) + b_head_ref[...]   # (Bblk,128)
        out_ref[...] = pose.astype(out_ref.dtype)


class PallasLinearPnPSolver:
    """Deterministic synthetic solver: weighted pooled correspondences -> linear pose head."""

    def __init__(self, eps=1e-5, normalize=False, max_tile_n=16384, b_block=8,
                 vmem_budget_bytes=12 * 1024 * 1024):
        self.eps = float(eps)
        self.normalize = bool(normalize)
        assert max_tile_n % _LANES == 0
        assert b_block % 8 == 0
        self.max_tile_n = int(max_tile_n)       # points (lanes) per grid step
        self.b_block = int(b_block)             # batches per grid step
        self.vmem_budget_bytes = int(vmem_budget_bytes)

        kW, kb = jax.random.split(jax.random.PRNGKey(42))
        self.W = (jax.random.normal(kW, (FEAT_DIM, POSE_DIM), jnp.float32)
                  * (1.0 / math.sqrt(FEAT_DIM)))
        self.b = jax.random.normal(kb, (POSE_DIM,), jnp.float32) * 0.01
        # Lane-dense padded copies (one vreg each); DMA'd once, resident across the grid.
        self.w_head = (jnp.zeros((CH, OUT_PAD), jnp.float32)
                       .at[:FEAT_DIM, :POSE_DIM].set(self.W))
        self.b_head = jnp.zeros((1, OUT_PAD), jnp.float32).at[0, :POSE_DIM].set(self.b)

        self._forward = jax.jit(self._forward_impl)

    def __call__(self, x3d, x2d, w2d):
        return self._forward(x3d, x2d, w2d)

    def _forward_impl(self, x3d, x2d, w2d):
        B, N, _ = x3d.shape

        # --- batch blocking --------------------------------------------------------
        bblk = min(self.b_block, B)
        b_pad = _round_up(B, bblk)

        # --- balanced point tiling, capped by a conservative VMEM budget ------------
        # VMEM per step ~= 2 x (input tile, double-buffered) + 1 x (f32 accumulator)
        #               = 3 * bblk * 8 * tn * 4 bytes.   Keep under ~12 MiB: safe vs.
        # v5e/v6e 16/32 MiB scoped defaults and v7x's 32 MiB scoped / 64 MiB physical.
        tn_cap = max(_LANES,
                     (self.vmem_budget_bytes // (3 * bblk * CH * 4)) // _LANES * _LANES)
        eff_max_tile = min(self.max_tile_n, tn_cap)
        num_tiles = _cdiv(N, eff_max_tile)
        tn = _round_up(_cdiv(N, num_tiles), _LANES)
        n_pad = num_tiles * tn

        # --- single fused layout pass: (B,N,C)x3 -> one (B_pad, 8, Npad) slab -------
        # Input dtype is preserved (bf16 stays bf16 through the HBM->VMEM DMA); the
        # kernel upcasts to f32. Padded points/batches have w2d == 0 -> zero weight.
        dt = jnp.result_type(x3d.dtype, x2d.dtype, w2d.dtype)
        ones = jnp.ones((B, N, 1), dt)
        feat = jnp.concatenate(
            [x3d.astype(dt), x2d.astype(dt), w2d.astype(dt), ones], axis=-1)  # (B, N, 8)
        feat = jnp.swapaxes(feat, 1, 2)                                        # (B, 8, N)
        feat = jnp.pad(feat, ((0, b_pad - B), (0, 0), (0, n_pad - N)))

        kernel = functools.partial(_solver_kernel, eps=self.eps,
                                   normalize=self.normalize, n_points=float(N))

        pose_pad = pl.pallas_call(
            kernel,
            out_shape=jax.ShapeDtypeStruct((b_pad, OUT_PAD), jnp.float32),
            grid_spec=pltpu.PrefetchScalarGridSpec(
                num_scalar_prefetch=0,
                grid=(b_pad // bblk, num_tiles),
                in_specs=[
                    pl.BlockSpec((bblk, CH, tn), lambda b, n: (b, 0, n)),
                    # Pose-head params: same block every step -> DMA'd once, stay resident.
                    pl.BlockSpec((CH, OUT_PAD), lambda b, n: (0, 0)),
                    pl.BlockSpec((1, OUT_PAD), lambda b, n: (0, 0)),
                ],
                out_specs=pl.BlockSpec((bblk, OUT_PAD), lambda b, n: (b, 0)),
                scratch_shapes=[pltpu.VMEM((bblk, CH, tn), jnp.float32)],
            ),
            compiler_params=pltpu.CompilerParams(
                # batch axis leading + parallel (v7x: sharded across TensorCores);
                # the point/reduction axis stays "arbitrary" and core-local.
                dimension_semantics=("parallel", "arbitrary")),
        )(feat, self.w_head, self.b_head)

        return pose_pad[:B, :POSE_DIM]          # (B, 7)

    # Pure-JAX reference for validation.
    def reference(self, x3d, x2d, w2d):
        x3d = x3d.astype(jnp.float32)
        x2d = x2d.astype(jnp.float32)
        w2d = w2d.astype(jnp.float32)
        feat = jnp.concatenate([x3d, x2d, w2d], axis=-1)           # (B, N, 7)
        w = jnp.mean(w2d, axis=-1, keepdims=True)                  # (B, N, 1)
        if self.normalize:
            w = w / (jnp.mean(w, axis=1, keepdims=True) + self.eps)
        pooled = jnp.sum(feat * w, axis=1) / (jnp.sum(w, axis=1) + self.eps)
        return pooled @ self.W + self.b[None, :]


class EProPnPBase:
    """JAX port of EProPnPBase: forward(*args, **kwargs) == solver(*args, **kwargs)."""

    def __init__(self, mc_samples=512, num_iter=4, normalize=False, eps=1e-5, solver=None):
        assert num_iter > 0
        assert mc_samples % num_iter == 0
        self.mc_samples = mc_samples
        self.num_iter = num_iter
        self.iter_samples = self.mc_samples // self.num_iter
        self.eps = eps
        self.normalize = normalize
        self.solver = solver

    def __call__(self, *args, **kwargs):
        return self.solver(*args, **kwargs)


if __name__ == "__main__":
    def make_inputs(key, B, N):
        k1, k2, k3 = jax.random.split(key, 3)
        x3d = jax.random.normal(k1, (B, N, 3), jnp.float32)
        x2d = jax.random.normal(k2, (B, N, 2), jnp.float32)
        w2d = jax.nn.softplus(jax.random.normal(k3, (B, N, 2), jnp.float32))
        return x3d, x2d, w2d

    # Case 1: tiny shapes (B=2, N=8), normalize=False, single point-tile, single b-block.
    solver = PallasLinearPnPSolver(eps=1e-5, normalize=False)
    model = EProPnPBase(mc_samples=512, num_iter=4, normalize=False,
                        eps=1e-5, solver=solver)
    x3d, x2d, w2d = make_inputs(jax.random.PRNGKey(0), B=2, N=8)
    pose = jax.block_until_ready(model(x3d, x2d, w2d))
    ref = solver.reference(x3d, x2d, w2d)
    assert pose.shape == (2, POSE_DIM)
    assert jnp.allclose(pose, ref, atol=1e-4, rtol=1e-4), "case1 mismatch vs JAX reference"

    # Case 2: multi-tile reduction over N (small tile forces 3 grid steps) + normalize path.
    solver2 = PallasLinearPnPSolver(eps=1e-5, normalize=True, max_tile_n=128)
    model2 = EProPnPBase(mc_samples=512, num_iter=4, normalize=True,
                         eps=1e-5, solver=solver2)
    x3d2, x2d2, w2d2 = make_inputs(jax.random.PRNGKey(0), B=2, N=300)
    pose2 = jax.block_until_ready(model2(x3d2, x2d2, w2d2))
    ref2 = solver2.reference(x3d2, x2d2, w2d2)
    assert pose2.shape == (2, POSE_DIM)
    assert jnp.allclose(pose2, ref2, atol=1e-4, rtol=1e-4), "case2 mismatch vs JAX reference"

    # Case 3: multiple batch-blocks with batch padding (B=10 -> 2 blocks of 8, B_pad=16).
    solver3 = PallasLinearPnPSolver(eps=1e-5, normalize=False)
    model3 = EProPnPBase(mc_samples=512, num_iter=4, normalize=False,
                         eps=1e-5, solver=solver3)
    x3d3, x2d3, w2d3 = make_inputs(jax.random.PRNGKey(0), B=10, N=1000)
    pose3 = jax.block_until_ready(model3(x3d3, x2d3, w2d3))
    ref3 = solver3.reference(x3d3, x2d3, w2d3)
    assert pose3.shape == (10, POSE_DIM)
    assert jnp.allclose(pose3, ref3, atol=1e-4, rtol=1e-4), "case3 mismatch vs JAX reference"

    print("KERNEL_OK")
</pallas_src>

<mosaic_0001>
module attributes {stable_mosaic.version = 11 : i64} {
  func.func @_solver_kernel(%arg0: i32, %arg1: i32, %arg2: memref<2x8x128xf32, #tpu.memory_space<vmem>>, %arg3: memref<8x128xf32, #tpu.memory_space<vmem>>, %arg4: memref<1x128xf32, #tpu.memory_space<vmem>>, %arg5: memref<2x128xf32, #tpu.memory_space<vmem>>, %arg6: memref<2x8x128xf32, #tpu.memory_space<vmem>>) attributes {dimension_semantics = [#tpu.dimension_semantics<parallel>, #tpu.dimension_semantics<arbitrary>], iteration_bounds = array<i64: 1, 1>, scalar_prefetch = 0 : i64, scratch_operands = 1 : i64, tpu.core_type = #tpu.core_type<tc>, window_params = [{transform_indices = @transform_0, window_bounds = array<i64: 2, 8, 128>}, {pipeline_mode = #tpu.pipeline_mode<synchronous>, transform_indices = @transform_1, window_bounds = array<i64: 8, 128>}, {pipeline_mode = #tpu.pipeline_mode<synchronous>, transform_indices = @transform_2, window_bounds = array<i64: 1, 128>}, {transform_indices = @transform_3, window_bounds = array<i64: 2, 128>}]} {
    %c0_i32 = arith.constant 0 : i32
    %0 = arith.cmpi eq, %arg1, %c0_i32 : i32
    %1 = arith.extui %0 : i1 to i32
    %c0_i32_0 = arith.constant 0 : i32
    %2 = arith.cmpi ne, %1, %c0_i32_0 : i32
    scf.if %2 {
      %cst_11 = arith.constant 0.000000e+00 : f32
      %17 = vector.broadcast %cst_11 : f32 to vector<2x8x128xf32>
      %c0_12 = arith.constant 0 : index
      %c0_13 = arith.constant 0 : index
      %c0_14 = arith.constant 0 : index
      %18 = vector.load %arg6[%c0_12, %c0_13, %c0_14] : memref<2x8x128xf32, #tpu.memory_space<vmem>>, vector<2x8x128xf32>
      tpu.vector_store %arg6[%c0_12, %c0_13, %c0_14], %17 {strides = array<i32>} : memref<2x8x128xf32, #tpu.memory_space<vmem>>, vector<2x8x128xf32>,
    } else {
    }
    %c0 = arith.constant 0 : index
    %c0_1 = arith.constant 0 : index
    %c0_2 = arith.constant 0 : index
    %3 = vector.load %arg2[%c0, %c0_1, %c0_2] : memref<2x8x128xf32, #tpu.memory_space<vmem>>, vector<2x8x128xf32>
    %4 = vector.extract_strided_slice %3 {offsets = [0, 5, 0], sizes = [2, 1, 128], strides = [1, 1, 1]} : vector<2x8x128xf32> to vector<2x1x128xf32>
    %5 = vector.extract_strided_slice %3 {offsets = [0, 6, 0], sizes = [2, 1, 128], strides = [1, 1, 1]} : vector<2x8x128xf32> to vector<2x1x128xf32>
    %6 = arith.addf %4, %5 : vector<2x1x128xf32>
    %cst = arith.constant 5.000000e-01 : f32
    %7 = vector.broadcast %cst : f32 to vector<2x1x128xf32>
    %8 = arith.mulf %7, %6 : vector<2x1x128xf32>
    %c0_3 = arith.constant 0 : index
    %c0_4 = arith.constant 0 : index
    %c0_5 = arith.constant 0 : index
    %9 = vector.load %arg6[%c0_3, %c0_4, %c0_5] : memref<2x8x128xf32, #tpu.memory_space<vmem>>, vector<2x8x128xf32>
    %10 = vector.broadcast %8 : vector<2x1x128xf32> to vector<2x8x128xf32>
    %11 = arith.mulf %3, %10 : vector<2x8x128xf32>
    %12 = arith.addf %9, %11 : vector<2x8x128xf32>
    %c0_6 = arith.constant 0 : index
    %c0_7 = arith.constant 0 : index
    %c0_8 = arith.constant 0 : index
    %13 = vector.load %arg6[%c0_6, %c0_7, %c0_8] : memref<2x8x128xf32, #tpu.memory_space<vmem>>, vector<2x8x128xf32>
    tpu.vector_store %arg6[%c0_6, %c0_7, %c0_8], %12 {strides = array<i32>} : memref<2x8x128xf32, #tpu.memory_space<vmem>>, vector<2x8x128xf32>,
    %c0_i32_9 = arith.constant 0 : i32
    %14 = arith.cmpi eq, %arg1, %c0_i32_9 : i32
    %15 = arith.extui %14 : i1 to i32
    %c0_i32_10 = arith.constant 0 : i32
    %16 = arith.cmpi ne, %15, %c0_i32_10 : i32
    scf.if %16 {
      %c0_11 = arith.constant 0 : index
      %c0_12 = arith.constant 0 : index
      %c0_13 = arith.constant 0 : index
      %17 = vector.load %arg6[%c0_11, %c0_12, %c0_13] : memref<2x8x128xf32, #tpu.memory_space<vmem>>, vector<2x8x128xf32>
      %cst_14 = arith.constant dense<0.000000e+00> : vector<2x8xf32>
      %18 = vector.multi_reduction <add>, %17, %cst_14 [2] : vector<2x8x128xf32> to vector<2x8xf32>
      %19 = vector.shape_cast %18 : vector<2x8xf32> to vector<2x8x1xf32>
      %20 = vector.extract_strided_slice %19 {offsets = [0, 7, 0], sizes = [2, 1, 1], strides = [1, 1, 1]} : vector<2x8x1xf32> to vector<2x1x1xf32>
      %cst_15 = arith.constant 9.99999974E-6 : f32
      %21 = vector.broadcast %cst_15 : f32 to vector<2x1x1xf32>
      %22 = arith.addf %20, %21 : vector<2x1x1xf32>
      %23 = tpu.reciprocal %22 {approx = true} : vector<2x1x1xf32> -> vector<2x1x1xf32>
      %24 = arith.mulf %22, %23 : vector<2x1x1xf32>
      %cst_16 = arith.constant 2.000000e+00 : f32
      %25 = vector.broadcast %cst_16 : f32 to vector<2x1x1xf32>
      %26 = arith.subf %25, %24 : vector<2x1x1xf32>
      %27 = arith.mulf %23, %26 : vector<2x1x1xf32>
      %28 = vector.broadcast %27 : vector<2x1x1xf32> to vector<2x8x1xf32>
      %29 = arith.mulf %19, %28 : vector<2x8x1xf32>
      %c0_17 = arith.constant 0 : index
      %c0_18 = arith.constant 0 : index
      %30 = vector.load %arg3[%c0_17, %c0_18] : memref<8x128xf32, #tpu.memory_space<vmem>>, vector<8x128xf32>
      %31 = vector.shape_cast %30 : vector<8x128xf32> to vector<1x8x128xf32>
      %32 = vector.broadcast %29 : vector<2x8x1xf32> to vector<2x8x128xf32>
      %33 = vector.broadcast %31 : vector<1x8x128xf32> to vector<2x8x128xf32>
      %34 = arith.mulf %32, %33 : vector<2x8x128xf32>
      %cst_19 = arith.constant dense<0.000000e+00> : vector<2x128xf32>
      %35 = vector.multi_reduction <add>, %34, %cst_19 [1] : vector<2x8x128xf32> to vector<2x128xf32>
      %c0_20 = arith.constant 0 : index
      %c0_21 = arith.constant 0 : index
      %36 = vector.load %arg4[%c0_20, %c0_21] : memref<1x128xf32, #tpu.memory_space<vmem>>, vector<1x128xf32>
      %37 = vector.broadcast %36 : vector<1x128xf32> to vector<2x128xf32>
      %38 = arith.addf %35, %37 : vector<2x128xf32>
      %c0_22 = arith.constant 0 : index
      %c0_23 = arith.constant 0 : index
      %39 = vector.load %arg5[%c0_22, %c0_23] : memref<2x128xf32, #tpu.memory_space<vmem>>, vector<2x128xf32>
      tpu.vector_store %arg5[%c0_22, %c0_23], %38 {strides = array<i32>} : memref<2x128xf32, #tpu.memory_space<vmem>>, vector<2x128xf32>,
    } else {
    }
    return
  }
  func.func @transform_0(%arg0: i32, %arg1: i32) -> (i32, i32, i32) {
    %c0_i32 = arith.constant 0 : i32
    %c0_i32_0 = arith.constant 0 : i32
    return %arg0, %c0_i32, %arg1 : i32, i32, i32
  }
  func.func @transform_1(%arg0: i32, %arg1: i32) -> (i32, i32) {
    %c0_i32 = arith.constant 0 : i32
    %c0_i32_0 = arith.constant 0 : i32
    %c0_i32_1 = arith.constant 0 : i32
    return %c0_i32, %c0_i32_0 : i32, i32
  }
  func.func @transform_2(%arg0: i32, %arg1: i32) -> (i32, i32) {
    %c0_i32 = arith.constant 0 : i32
    %c0_i32_0 = arith.constant 0 : i32
    %c0_i32_1 = arith.constant 0 : i32
    return %c0_i32, %c0_i32_0 : i32, i32
  }
  func.func @transform_3(%arg0: i32, %arg1: i32) -> (i32, i32) {
    %c0_i32 = arith.constant 0 : i32
    %c0_i32_0 = arith.constant 0 : i32
    return %arg0, %c0_i32 : i32, i32
  }
}

</mosaic_0001>

<bundles_post_ra>
// kernel: _forward_impl.1
= control target key start
LH: loop header
LB: loop body
LE: loop exit
PB: predicated region body
PF: predicated region fallthrough
CT: control target
= control target key end

     0   :  { %v35_v1 = vlaneseq  ;;  %s198_s0 = inlined_call_operand.vmem [shape: f32[2,8,128], index: 0, kind: input, shape index: {}]   ;;  %s199_s1 = inlined_call_operand.vmem [shape: f32[8,128], index: 1, kind: input, shape index: {}]   ;;  %s200_s2 = inlined_call_operand.vmem [shape: f32[1,128], index: 2, kind: input, shape index: {}]   ;;  %s201_s3 = inlined_call_operand.hbm [shape: f32[2,128], index: 3, kind: output, shape index: {}]  }
   0x1   :  { %v22_v0 = vld [vmem:[%s198_s0 + $0x8] sm:$0xff]  ;;  %v21_v2 = vld [vmem:[%s198_s0] sm:$0xff] }
   0x2   :  { %8 = vsyncpa [#allocation4], 0  ;;  %v26_v3 = vrot.slane %v22_v0, 1  ;;  %v25_v4 = vrot.slane %v21_v2, 1  ;;  %v36_v5 = vshrl.u32 %v35_v1, 7  ;;  %v78_v28 = vld [vmem:[%s199_s1] sm:$0xff] }
   0x3   :  { %v123_v43 = vld [vmem:[%s200_s2] ss:$0 sm:$0xff]  ;;  %s153_s1 = smov [#allocation3]   ;;  %vm105_vm0 = vcmask 1041409  }
   0x4   :  { %v30_v6 = vadd.f32 %v26_v3, %v22_v0  ;;  %v29_v7 = vadd.f32 %v25_v4, %v21_v2  ;;  %v37_v8 = vsub.s32 5, %v36_v5  ;;  %v70_v21 = vsub.s32 7, %v36_v5  ;;  %s115_s19 = sshll.u32 %s153_s1, 4  ;;  %s116_s19 = int_to_ptr.vmem [resolvable:$true] %s115_s19 }
   0x5   :  { %s129_s20 = scalar_lea.vmem %s116_s19, 32  ;;  %p134_p1 = scmp.lt.s32.totalorder %s116_s19, %s116_s19 }
   0x6   :  { %v32_v9 = vmul.f32 0.5, %v30_v6  ;;  %v31_v10 = vmul.f32 0.5, %v29_v7  ;;  %p130_p0 = scmp.ne.s32.totalorder %s116_s19, %s129_s20  ;;  %p135_p2 = scmp.lt.s32.totalorder %s129_s20, %s129_s20 }
   0x8   :  { %v42_v11 = vrot.slane %v32_v9, %v37_v8  ;;  %v38_v12 = vrot.slane %v31_v10, %v37_v8  ;;  %p136_p3 = por %p135_p2, %p134_p1 }
   0xa   :  { %v44_v13 = vmul.f32 %v42_v11, %v22_v0  ;;  %v43_v14 = vmul.f32 %v38_v12, %v21_v2  ;;  %p137_p4 = pnand %p136_p3, %p130_p0 }
   0xc   :  { %56 = vadd.xlane.f32.xlu0 %v44_v13 }
  0x10   :  { %54 = vadd.xlane.f32.xlu0 %v43_v14 }
  0x99   :  { %v57_v15 = vpop.xlane.xlu0 %56 }
  0x9a   :  { %v59_v16 = vadd.f32 1e-05, %v57_v15 }
  0x9c   :  { %125 = vrcp.f32 %v59_v16 }
  0x9d   :  { %v55_v17 = vpop.xlane.xlu0 %54 }
  0x9e   :  { %v58_v18 = vadd.f32 1e-05, %v55_v17 }
  0xa0   :  { %127 = vrcp.f32 %v58_v18 }
  0xa6   :  { %v126_v19 = vpop.eup %125 }
  0xa7   :  { %v63_v20 = vmul.f32 %v126_v19, %v59_v16 }
  0xa9   :  { %v65_v22 = vsub.f32 2.0, %v63_v20 }
  0xaa   :  { %v128_v23 = vpop.eup %127 }
  0xab   :  { %v67_v24 = vmul.f32 %v126_v19, %v65_v22  ;;  %v62_v25 = vmul.f32 %v128_v23, %v58_v18 }
  0xad   :  { %v75_v26 = vrot.slane %v67_v24, %v70_v21  ;;  %v64_v27 = vsub.f32 2.0, %v62_v25 }
  0xaf   :  { %v77_v29 = vmul.f32 %v75_v26, %v57_v15  ;;  %v66_v30 = vmul.f32 %v128_v23, %v64_v27 }
  0xb1   :  { %v80_v31 = vmul.f32 %v78_v28, %v77_v29  ;;  %v71_v32 = vrot.slane %v66_v30, %v70_v21 }
  0xb3   :  { %v87_v33 = vrot.slane %v80_v31, 4  ;;  %v76_v34 = vmul.f32 %v71_v32, %v55_v17 }
  0xb5   :  { %v88_v35 = vadd.f32 %v87_v33, %v80_v31  ;;  %v79_v36 = vmul.f32 %v78_v28, %v76_v34 }
  0xb7   :  { %v89_v37 = vrot.slane %v88_v35, 2  ;;  %v81_v38 = vrot.slane %v79_v36, 4 }
  0xb9   :  { %v90_v39 = vadd.f32 %v89_v37, %v88_v35  ;;  %v82_v40 = vadd.f32 %v81_v38, %v79_v36 }
  0xbb   :  { %v91_v41 = vrot.slane %v90_v39, 1  ;;  %v83_v42 = vrot.slane %v82_v40, 2 }
  0xbd   :  { %v84_v44 = vadd.f32 %v83_v42, %v82_v40  ;;  %v92_v45 = vadd.f32 %v91_v41, %v90_v39 }
  0xbf   :  { %v85_v46 = vrot.slane %v84_v44, 1  ;;  %v101_v47 = vadd.f32 %v123_v43, %v92_v45 }
  0xc1   :  { %v86_v48 = vadd.f32 %v85_v46, %v84_v44  ;;  %v104_v50 = vrot.slane %v101_v47, 7 }
  0xc3   :  { %v100_v49 = vadd.f32 %v123_v43, %v86_v48 }
  0xc5   :  { %v106_v51 = vsel %vm105_vm0, %v104_v50, %v100_v49 }
  0xc6   :  { %108 = vst [vmem:[#allocation3] sm:$0x3] %v106_v51 }
  0xc7   :  { %140 = shalt.err (!%p137_p4)
}
  0xc8   :  { %s141_s22 = scalar_lea.hbm %s201_s3, 32 }
  0xc9   :  { %p142_p5 = scmp.ne.s32.totalorder %s201_s3, %s141_s22  ;;  %p145_p6 = scmp.lt.u32.totalorder %s141_s22, %s201_s3 }
  0xcb   :  { %p147_p7 = pnand %p145_p6, %p142_p5 }
  0xcd   :  { %150 = shalt.err (!%p147_p7)
}
  0xce   :  { %118 = dma.vmem_to_hbm [thread:$0]  %s116_s19, 32, %s201_s3, [#allocation4]  }
  0xcf   :  { %151 = dma.done.wait [#allocation4], 32  }
  0xd0   :  { %152 = vsyncadd [#allocation4], 4294967264 }
  0xd1   :  { %122 = vsyncpa [#allocation4], 1 }

</bundles_post_ra>
